<compile_context>
chip_gen: v5e
topology: v5e:2x2
jax: 0.10.0
libtpu: 0.0.40
codegen_flags: <defaults>
</compile_context>

<pallas_src>
import functools

import jax
import jax.numpy as jnp
from jax.experimental import pallas as pl
from jax.experimental.pallas import tpu as pltpu

N_BITS = 8
_QMAX = 2.0 ** N_BITS - 1.0          # 255
_LANES = 128
_SUBLANES = 8
_TILE_ROWS = 4096                    # (4096, 128) f32 tile = 2 MiB


def _tpu_vmem_capacity_bytes():
    """Physical VMEM size (fallback: 64 MiB, the smallest of v5e/v6e/v7x)."""
    try:
        cap = int(pltpu.get_tpu_info().vmem_capacity_bytes)
        if cap > 0:
            return cap
    except Exception:
        pass
    return 64 * 1024 * 1024


def _tpu_num_tensorcores():
    """Best-effort TensorCore count (1 on v5e/v6e, 2 on v7x); fallback 1."""
    # TODO(synk): verify on v7x that plain "parallel" semantics shard the grid
    # across both TensorCores; if not, switch pass-1's leading axis (and pass 2)
    # to pltpu.CORE_PARALLEL.
    try:
        info = pltpu.get_tpu_info()
        for attr in ("num_cores", "core_count", "num_tensorcores",
                     "tensorcores_per_chip", "num_cores_per_chip"):
            v = getattr(info, attr, None)
            if v is not None and 1 <= int(v) <= 4:
                return int(v)
    except Exception:
        pass
    return 1


def _fake_quant(xf, mn, mx):
    """Asymmetric 8-bit fake quant with the degenerate case folded into scalars.

    When mx == mn every element equals mn, so with scale = inv_scale = 0 the
    result is exactly mn == x: no per-element select is needed.
    """
    diff = mx - mn
    degen = diff == 0.0
    scale = jnp.where(degen, 0.0, _QMAX / jnp.where(degen, 1.0, diff))
    inv_scale = jnp.where(degen, 0.0, diff * (1.0 / _QMAX))  # mul, not per-elem div
    return jnp.round((xf - mn) * scale) * inv_scale + mn


def _fused_quant_kernel(x_ref, o_ref):
    """Whole slab resident in VMEM: global min/max + fake-quant in one pass."""
    xf = x_ref[...].astype(jnp.float32)
    o_ref[...] = _fake_quant(xf, jnp.min(xf), jnp.max(xf)).astype(o_ref.dtype)


def _minmax_kernel(x_ref, mn_ref, mx_ref, mn_acc, mx_acc, *,
                   rows_valid, tile_rows, num_tiles, inner):
    """Pass 1: tiled global min/max. Grid = (num_splits, inner)."""
    c = pl.program_id(0)
    i = pl.program_id(1)

    @pl.when(i == 0)
    def _():
        mn_acc[...] = jnp.full_like(mn_acc, jnp.inf)
        mx_acc[...] = jnp.full_like(mx_acc, -jnp.inf)

    xf = x_ref[...].astype(jnp.float32)

    def _accumulate(x_min, x_max):
        # Per-step reduce onto an (8,128) accumulator: elementwise VPU min/max
        # across vregs; the XLU cross-lane collapse happens once, at the end.
        if tile_rows % _SUBLANES == 0:
            part_mn = jnp.min(
                x_min.reshape(tile_rows // _SUBLANES, _SUBLANES, _LANES), axis=0)
            part_mx = jnp.max(
                x_max.reshape(tile_rows // _SUBLANES, _SUBLANES, _LANES), axis=0)
        else:  # only reachable for tiny, forced-two-pass inputs
            part_mn = jnp.min(x_min, axis=0, keepdims=True)
            part_mx = jnp.max(x_max, axis=0, keepdims=True)
        mn_acc[...] = jnp.minimum(mn_acc[...], part_mn)
        mx_acc[...] = jnp.maximum(mx_acc[...], part_mx)

    tail_rows = rows_valid % tile_rows          # static Python int
    if tail_rows == 0:
        _accumulate(xf, xf)
    else:
        # Masking hoisted out of the hot loop: only the ragged LAST tile (whose
        # trailing rows are undefined pipeline padding) pays iota/compare/select;
        # every other tile stays on the plain min/max path (HBM-roofline bound).
        is_last = (c * inner + i) >= (num_tiles - 1)  # clamped duplicates land here too

        @pl.when(jnp.logical_not(is_last))
        def _():
            _accumulate(xf, xf)

        @pl.when(is_last)
        def _():
            row_in_tile = jax.lax.broadcasted_iota(jnp.int32, (tile_rows, _LANES), 0)
            valid = row_in_tile < tail_rows
            _accumulate(jnp.where(valid, xf, jnp.inf),
                        jnp.where(valid, xf, -jnp.inf))

    @pl.when(i == inner - 1)
    def _():
        mn_ref[0, 0] = jnp.min(mn_acc[...])
        mx_ref[0, 0] = jnp.max(mx_acc[...])


def _quant_kernel(mn_ref, mx_ref, x_ref, o_ref, *, num_splits):
    """Pass 2: elementwise asymmetric fake-quant of one (tile_rows, 128) tile."""
    mn = mn_ref[0, 0]
    mx = mx_ref[0, 0]
    for s in range(1, num_splits):              # combine per-core partials (scalar SMEM)
        mn = jnp.minimum(mn, mn_ref[s, 0])
        mx = jnp.maximum(mx, mx_ref[s, 0])
    xf = x_ref[...].astype(jnp.float32)
    o_ref[...] = _fake_quant(xf, mn, mx).astype(o_ref.dtype)


def quant_layer(x, *, fused_max_f32_bytes=None, tile_rows=None,
                num_splits=None, donate_input=False):
    """JAX/Pallas equivalent of QuantLayer.forward (modo=0, n_bits=8)."""
    orig_shape = x.shape
    orig_dtype = x.dtype

    vmem_cap = _tpu_vmem_capacity_bytes()
    if fused_max_f32_bytes is None:
        # The fused body keeps the input slab, the output, and a few full-size
        # f32 temporaries resident (~5-6x the f32 working set); size off VMEM.
        # 128 MiB chips (v5e/v6e) -> 8 MiB working set; 64 MiB v7x -> ~5.3 MiB.
        fused_max_f32_bytes = min(8 * 1024 * 1024, vmem_cap // 12)
    fused_vmem_limit = min(96 * 1024 * 1024, (vmem_cap * 3) // 4)
    if num_splits is None:
        num_splits = _tpu_num_tensorcores()

    xf = x.reshape(-1)                   # reshape of a contiguous array: no copy
    n = xf.shape[0]
    rem = n % _LANES
    if rem:
        # TODO(synk): handle n % 128 != 0 inside the kernels (masked tail) instead
        # of this wrapper-side pad + slice; typical NCHW activations never hit it.
        xf = jnp.concatenate([xf, jnp.full((_LANES - rem,), xf[0], dtype=orig_dtype)])
    rows = xf.shape[0] // _LANES
    x2 = xf.reshape(rows, _LANES)

    if n * 4 <= fused_max_f32_bytes:
        # ---- fused single-pass path: whole slab resident in VMEM --------------
        # TODO(synk): a manually pipelined (emit_pipeline-style) single-read path
        # would overlap the DMA with the min/max and raise this ceiling further.
        y2 = pl.pallas_call(
            _fused_quant_kernel,
            out_shape=jax.ShapeDtypeStruct((rows, _LANES), orig_dtype),
            in_specs=[pl.BlockSpec((rows, _LANES), lambda: (0, 0))],
            out_specs=pl.BlockSpec((rows, _LANES), lambda: (0, 0)),
            compiler_params=pltpu.CompilerParams(vmem_limit_bytes=fused_vmem_limit),
        )(x2)
    else:
        # ---- two-pass streaming path with large (2 MiB) tiles ------------------
        tile = tile_rows if tile_rows is not None else _TILE_ROWS
        tile = min(tile, rows)
        num_tiles = pl.cdiv(rows, tile)
        inner = pl.cdiv(num_tiles, num_splits)   # tiles handled by each split

        def x_index_map(c, i):
            # Clamp so a half-empty split never goes out of bounds; a duplicated
            # tile is harmless for a min/max reduction.
            return (jnp.minimum(c * inner + i, num_tiles - 1), 0)

        mn, mx = pl.pallas_call(
            functools.partial(_minmax_kernel, rows_valid=rows, tile_rows=tile,
                              num_tiles=num_tiles, inner=inner),
            out_shape=(jax.ShapeDtypeStruct((num_splits, 1), jnp.float32),
                       jax.ShapeDtypeStruct((num_splits, 1), jnp.float32)),
            grid=(num_splits, inner),
            in_specs=[pl.BlockSpec((tile, _LANES), x_index_map)],
            out_specs=(
                pl.BlockSpec((1, 1), lambda c, i: (c, 0), memory_space=pltpu.SMEM),
                pl.BlockSpec((1, 1), lambda c, i: (c, 0), memory_space=pltpu.SMEM),
            ),
            scratch_shapes=[pltpu.VMEM((_SUBLANES, _LANES), jnp.float32),
                            pltpu.VMEM((_SUBLANES, _LANES), jnp.float32)],
            compiler_params=pltpu.CompilerParams(
                dimension_semantics=("parallel", "arbitrary"),
                vmem_limit_bytes=32 * 1024 * 1024),
        )(x2)

        y2 = pl.pallas_call(
            functools.partial(_quant_kernel, num_splits=num_splits),
            out_shape=jax.ShapeDtypeStruct((rows, _LANES), orig_dtype),
            grid=(num_tiles,),
            in_specs=[
                pl.BlockSpec((num_splits, 1), lambda i: (0, 0), memory_space=pltpu.SMEM),
                pl.BlockSpec((num_splits, 1), lambda i: (0, 0), memory_space=pltpu.SMEM),
                pl.BlockSpec((tile, _LANES), lambda i: (i, 0)),
            ],
            out_specs=pl.BlockSpec((tile, _LANES), lambda i: (i, 0)),
            # Optional in-place overwrite of x2 (tile-for-tile read-then-write is
            # alias-safe); off by default so the caller's x is left intact.
            input_output_aliases=({2: 0} if donate_input else {}),
            compiler_params=pltpu.CompilerParams(
                dimension_semantics=("parallel",),
                vmem_limit_bytes=32 * 1024 * 1024),
        )(mn, mx, x2)

    y = y2.reshape(-1)
    if rem:
        y = y[:n]
    return y.reshape(orig_shape)


def _reference(x):
    """Pure-JAX reference of QuantLayer.forward (modo=0)."""
    xf = x.astype(jnp.float32)
    mini = jnp.min(xf)
    maxi = jnp.max(xf)
    diff = maxi - mini
    safe = jnp.where(diff == 0.0, 1.0, diff)
    scale = _QMAX / safe
    q = jnp.round((xf - mini) * scale) / scale + mini
    return jnp.where(diff == 0.0, xf, q).astype(x.dtype)


if __name__ == "__main__":
    key = jax.random.PRNGKey(0)
    # QuantLayer is shape-agnostic; use a conv-style NCHW activation.
    x = jax.random.normal(key, (2, 4, 16, 16), dtype=jnp.float32)
    y_ref = _reference(x)

    # Fused single-pass path (default for small/medium activations).
    y = jax.block_until_ready(quant_layer(x))
    assert y.shape == x.shape and y.dtype == x.dtype
    assert jnp.allclose(y, y_ref, atol=1e-4, rtol=1e-4), "fused path mismatch"

    # Two-pass streaming path (forced, single tile).
    y2p = jax.block_until_ready(quant_layer(x, fused_max_f32_bytes=0))
    assert jnp.allclose(y2p, y_ref, atol=1e-4, rtol=1e-4), "two-pass path mismatch"

    # Two-pass streaming path with multiple tiles and a ragged last tile
    # (exercises the hoisted pl.when masking branch) at a small scale.
    x_r = jax.random.normal(jax.random.PRNGKey(1), (2, 4, 16, 20), dtype=jnp.float32)
    y_r = jax.block_until_ready(quant_layer(x_r, fused_max_f32_bytes=0, tile_rows=8))
    assert jnp.allclose(y_r, _reference(x_r), atol=1e-4, rtol=1e-4), \
        "ragged two-pass path mismatch"

    # Narrow-dtype path: bf16 stays bf16 at the HBM boundary, math in f32.
    xb = x.astype(jnp.bfloat16)
    yb = jax.block_until_ready(quant_layer(xb))
    yb_ref = _reference(xb)
    assert yb.dtype == jnp.bfloat16
    assert jnp.allclose(yb.astype(jnp.float32), yb_ref.astype(jnp.float32),
                        atol=2e-2, rtol=2e-2), "bf16 path mismatch"

    print("KERNEL_OK")
</pallas_src>

<mosaic_0001>
module attributes {stable_mosaic.version = 11 : i64} {
  func.func @_fused_quant_kernel(%arg0: memref<16x128xf32, #tpu.memory_space<vmem>>, %arg1: memref<16x128xf32, #tpu.memory_space<vmem>>) attributes {dimension_semantics = [], scalar_prefetch = 0 : i64, scratch_operands = 0 : i64, tpu.core_type = #tpu.core_type<tc>} {
    %c0 = arith.constant 0 : index
    %c0_0 = arith.constant 0 : index
    %0 = vector.load %arg0[%c0, %c0_0] : memref<16x128xf32, #tpu.memory_space<vmem>>, vector<16x128xf32>
    %1 = vector.shape_cast %0 : vector<16x128xf32> to vector<1x16x128xf32>
    %cst = arith.constant dense<0x7F800000> : vector<1xf32>
    %2 = vector.multi_reduction <minimumf>, %1, %cst [1, 2] : vector<1x16x128xf32> to vector<1xf32>
    %3 = vector.shape_cast %2 : vector<1xf32> to vector<1x1x1xf32>
    %4 = vector.extract %3[0, 0, 0] : f32 from vector<1x1x1xf32>
    %5 = vector.shape_cast %0 : vector<16x128xf32> to vector<1x16x128xf32>
    %cst_1 = arith.constant dense<0xFF800000> : vector<1xf32>
    %6 = vector.multi_reduction <maximumf>, %5, %cst_1 [1, 2] : vector<1x16x128xf32> to vector<1xf32>
    %7 = vector.shape_cast %6 : vector<1xf32> to vector<1x1x1xf32>
    %8 = vector.extract %7[0, 0, 0] : f32 from vector<1x1x1xf32>
    %9 = arith.subf %8, %4 : f32
    %cst_2 = arith.constant 0.000000e+00 : f32
    %10 = arith.cmpf oeq, %9, %cst_2 : f32
    %cst_3 = arith.constant 1.000000e+00 : f32
    %11 = arith.select %10, %cst_3, %9 : f32
    %cst_4 = arith.constant 2.550000e+02 : f32
    %12 = arith.divf %cst_4, %11 : f32
    %cst_5 = arith.constant 0.000000e+00 : f32
    %13 = arith.select %10, %cst_5, %12 : f32
    %cst_6 = arith.constant 0.00392156886 : f32
    %14 = arith.mulf %9, %cst_6 : f32
    %cst_7 = arith.constant 0.000000e+00 : f32
    %15 = arith.select %10, %cst_7, %14 : f32
    %16 = vector.broadcast %4 : f32 to vector<16x128xf32>
    %17 = arith.subf %0, %16 : vector<16x128xf32>
    %18 = vector.broadcast %13 : f32 to vector<16x128xf32>
    %19 = arith.mulf %17, %18 : vector<16x128xf32>
    %20 = math.roundeven %19 : vector<16x128xf32>
    %21 = vector.broadcast %15 : f32 to vector<16x128xf32>
    %22 = arith.mulf %20, %21 : vector<16x128xf32>
    %23 = vector.broadcast %4 : f32 to vector<16x128xf32>
    %24 = arith.addf %22, %23 : vector<16x128xf32>
    %c0_8 = arith.constant 0 : index
    %c0_9 = arith.constant 0 : index
    %25 = vector.load %arg1[%c0_8, %c0_9] : memref<16x128xf32, #tpu.memory_space<vmem>>, vector<16x128xf32>
    tpu.vector_store %arg1[%c0_8, %c0_9], %24 {strides = array<i32>} : memref<16x128xf32, #tpu.memory_space<vmem>>, vector<16x128xf32>,
    return
  }
}

</mosaic_0001>

<bundles_post_ra>
// kernel: tpu_custom_call.1
= control target key start
LH: loop header
LB: loop body
LE: loop exit
PB: predicated region body
PF: predicated region fallthrough
CT: control target
= control target key end

     0   :  { %6 = vsyncpa [#allocation3], 0  ;;  %s221_s0 = inlined_call_operand.hbm [shape: f32[16,128], index: 0, kind: input, shape index: {}]   ;;  %s222_s1 = inlined_call_operand.hbm [shape: f32[16,128], index: 1, kind: output, shape index: {}]  }
   0x1   :  { %7 = vsyncpa [#allocation4], 0  ;;  %s12_s8 = sshll.u32 %s221_s0, 4  ;;  %s184_s9 = smov [#allocation2]   ;;  %s13_s8 = int_to_ptr.hbm [resolvable:$true] %s12_s8 }
   0x2   :  { %s14_s10 = sshll.u32 %s184_s9, 4  ;;  %s185_s11 = smov 128   ;;  %s15_s10 = int_to_ptr.vmem [resolvable:$true] %s14_s10 }
   0x3   :  { %s186_s12 = smov 8  }
   0x4   :  { %20 = dma.hbm_to_vmem [thread:$0]  %s13_s8, 256, %s15_s10, [#allocation3], %s185_s11, %s185_s11, %s186_s12  }
   0x5   :  { %180 = dma.done.wait [#allocation3], 256  }
   0x6   :  { %181 = vsyncadd [#allocation3], 4294967040  ;;  %v25_v0 = vld [vmem:[#allocation2] sm:$0xff]  ;;  %v26_v1 = vld [vmem:[#allocation2 + $0x8] sm:$0xff]  ;;  %s187_s19 = smov [#allocation5]   ;;  %s91_s23 = sshll.u32 %s222_s1, 4  ;;  %s92_s23 = int_to_ptr.hbm [resolvable:$true] %s91_s23 }
   0x7   :  { %v27_v2 = vmin.f32 %v25_v0, %v26_v1  ;;  %v37_v3 = vmax.f32 %v25_v0, %v26_v1  ;;  %s89_s20 = sshll.u32 %s187_s19, 4  ;;  %s90_s20 = int_to_ptr.vmem [resolvable:$true] %s89_s20 }
   0x9   :  { %28 = vmin.xlane.f32.xlu0 %v27_v2 }
  0x11   :  { %38 = vmax.xlane.f32.xlu0 %v37_v3 }
  0x7c   :  { %v29_v4 = vpop.xlane.xlu0 %28 }
  0x7d   :  { %v30_v5 = vrot.slane %v29_v4, 4 }
  0x7f   :  { %v31_v6 = vmin.f32 %v29_v4, %v30_v5 }
  0x81   :  { %v32_v7 = vrot.slane %v31_v6, 2 }
  0x83   :  { %v33_v8 = vmin.f32 %v31_v6, %v32_v7 }
  0x84   :  { %v39_v9 = vpop.xlane.xlu0 %38 }
  0x85   :  { %v40_v10 = vrot.slane %v39_v9, 4  ;;  %v34_v11 = vrot.slane %v33_v8, 1 }
  0x87   :  { %v41_v12 = vmax.f32 %v39_v9, %v40_v10  ;;  %v35_v13 = vmin.f32 %v33_v8, %v34_v11 }
  0x89   :  { %v42_v14 = vrot.slane %v41_v12, 2  ;;  %104 = vpush %v35_v13 }
  0x8b   :  { %v43_v15 = vmax.f32 %v41_v12, %v42_v14 }
  0x8d   :  { %v44_v16 = vrot.slane %v43_v15, 1 }
  0x8f   :  { %v45_v17 = vmax.f32 %v43_v15, %v44_v16 }
  0x91   :  { %106 = vpush %v45_v17 }
  0xba   :  { %s105_s0 = spop %104 }
  0xbb   :  { %v70_v29 = vstv %s105_s0 }
  0xbc   :  { %v71_v30 = vsub.f32 %v25_v0, %v70_v29  ;;  %v72_v31 = vsub.f32 %v26_v1, %v70_v29 }
  0xc2   :  { %s107_s13 = spop %106 }
  0xc3   :  { %s204_s14 = ssub.f32 %s107_s13, %s105_s0 }
  0xc5   :  { %p48_p0 = scmp.eq.f32.partialorder %s204_s14, 0.0  ;;  %s68_s18 = smul.f32 0.003921569, %s204_s14 }
  0xc7   :  { %s49_s15 = scalar_select %p48_p0, 1.0, %s204_s14 }
  0xc8   :  { %s226_s18 = smov (%p48_p0, %s68_s18), 0.0 }
  0xc9   :  { %v50_v18 = vstv %s49_s15  ;;  %v78_v47 = vstv %s226_s18 }
  0xca   :  { %130 = vrcp.f32 %v50_v18  ;;  %v62_v22 = vand.u32 2147483648, %v50_v18  ;;  %v60_v24 = vand.u32 2147483647, %v50_v18  ;;  %vm56_vm1 = vweird.f32 %v50_v18 }
  0xcc   :  { %v63_v26 = vor.u32 1.1754944e-38, %v62_v22  ;;  %vm61_vm3 = vcmp.eq.f32.partialorder %v60_v24, 8.507059e+37 }
  0xd0   :  { %v131_v19 = vpop.eup %130 }
  0xd1   :  { %v52_v20 = vmul.f32 %v131_v19, %v50_v18  ;;  %vm57_vm0 = vweird.f32 %v131_v19 }
  0xd2   :  { %vm58_vm2 = vmor %vm56_vm1, %vm57_vm0 }
  0xd3   :  { %v53_v21 = vsub.f32 1.0, %v52_v20 }
  0xd5   :  { %v54_v23 = vmul.f32 %v131_v19, %v53_v21 }
  0xd7   :  { %v55_v25 = vadd.f32 %v131_v19, %v54_v23 }
  0xd9   :  { %v59_v27 = vsel %vm58_vm2, %v131_v19, %v55_v25 }
  0xda   :  { %v64_v28 = vsel %vm61_vm3, %v63_v26, %v59_v27 }
  0xdb   :  { %108 = vpush %v64_v28 }
 0x10c   :  { %s109_s16 = spop %108 }
 0x10d   :  { %s66_s17 = smul.f32 255.0, %s109_s16 }
 0x10f   :  { %s224_s17 = smov (%p48_p0, %s66_s17), 0.0 }
 0x110   :  { %v73_v32 = vstv %s224_s17 }
 0x111   :  { %v74_v33 = vmul.f32 %v73_v32, %v71_v30  ;;  %v75_v34 = vmul.f32 %v73_v32, %v72_v31 }
 0x113   :  { %v112_v35 = vcvt.f32.s32 %v74_v33  ;;  %v120_v36 = vcvt.f32.s32 %v75_v34  ;;  %v110_v38 = vand.u32 2147483647, %v74_v33  ;;  %v115_v41 = vand.u32 2147483648, %v74_v33 }
 0x114   :  { %v118_v42 = vand.u32 2147483647, %v75_v34  ;;  %v123_v44 = vand.u32 2147483648, %v75_v34 }
 0x115   :  { %v113_v37 = vcvt.s32.f32 %v112_v35  ;;  %v121_v39 = vcvt.s32.f32 %v120_v36  ;;  %vm111_vm4 = vcmp.lt.f32.partialorder %v110_v38, 8388608.0 }
 0x116   :  { %vm119_vm5 = vcmp.lt.f32.partialorder %v118_v42, 8388608.0 }
 0x117   :  { %v114_v40 = vand.u32 2147483647, %v113_v37  ;;  %v122_v43 = vand.u32 2147483647, %v121_v39 }
 0x119   :  { %v116_v45 = vor.u32 %v115_v41, %v114_v40  ;;  %v124_v46 = vor.u32 %v123_v44, %v122_v43 }
 0x11b   :  { %v117_v48 = vsel %vm111_vm4, %v116_v45, %v74_v33  ;;  %v125_v49 = vsel %vm119_vm5, %v124_v46, %v75_v34 }
 0x11c   :  { %v79_v50 = vmul.f32 %v117_v48, %v78_v47  ;;  %v80_v51 = vmul.f32 %v125_v49, %v78_v47 }
 0x11e   :  { %v81_v52 = vadd.f32 %v79_v50, %v70_v29  ;;  %v82_v53 = vadd.f32 %v80_v51, %v70_v29 }
 0x120   :  { %83 = vst [vmem:[#allocation5] sm:$0xff] %v81_v52 }
 0x121   :  { %84 = vst [vmem:[#allocation5 + $0x8] sm:$0xff] %v82_v53 }
 0x122   :  { %97 = dma.vmem_to_hbm [thread:$0]  %s90_s20, 256, %s92_s23, [#allocation4], %s185_s11, %s185_s11, %s186_s12  }
 0x123   :  { %182 = dma.done.wait [#allocation4], 256  }
 0x124   :  { %183 = vsyncadd [#allocation4], 4294967040 }
 0x125   :  { %102 = vsyncpa [#allocation3], 1 }
 0x126   :  { %103 = vsyncpa [#allocation4], 1 }

</bundles_post_ra>
